<compile_context>
chip_gen: v7x
topology: tpu7x:2x2x1
jax: 0.10.0
libtpu: 0.0.40
codegen_flags: <defaults>
</compile_context>

<pallas_src>
import jax
import jax.numpy as jnp
from jax.experimental import pallas as pl
from jax.experimental.pallas import tpu as pltpu

_LANE = 128
_SUBLANE = 8


def _round_up(x, m):
    return ((x + m - 1) // m) * m


def _generator_kernel(z_ref, w1_ref, b1_ref, w2_ref, b2_ref, w3_ref, b3_ref, out_ref):
    # Fully fused 3-layer MLP; everything stays VMEM/vreg resident, accumulate f32.
    z = z_ref[...]
    h1 = jnp.dot(z.astype(w1_ref.dtype), w1_ref[...],
                 preferred_element_type=jnp.float32)
    h1 = jnp.maximum(h1 + b1_ref[...].astype(jnp.float32), 0.0)        # ReLU
    h2 = jnp.dot(h1.astype(w2_ref.dtype), w2_ref[...],
                 preferred_element_type=jnp.float32)
    h2 = jnp.maximum(h2 + b2_ref[...].astype(jnp.float32), 0.0)        # ReLU
    h3 = jnp.dot(h2.astype(w3_ref.dtype), w3_ref[...],
                 preferred_element_type=jnp.float32)
    h3 = h3 + b3_ref[...].astype(jnp.float32)
    out_ref[...] = jnp.tanh(h3).astype(out_ref.dtype)                  # Tanh


def generator_forward(z, params, *, tile_b=1024, param_dtype=None, out_dtype=None,
                      single_buffer_weights=False, return_padded=False):
    """z: (B, noise_dim).
    params: w{1,2,3} stored as (in_features, out_features), b{1,2,3} as (1, out_features).
    param_dtype=jnp.bfloat16 enables the MXU-peak path (f32 accumulation kept)."""
    w1, b1, w2, b2, w3, b3 = (params[k] for k in ("w1", "b1", "w2", "b2", "w3", "b3"))
    if param_dtype is not None:
        w1, b1, w2, b2, w3, b3 = (a.astype(param_dtype)
                                  for a in (w1, b1, w2, b2, w3, b3))
    B, noise_dim = z.shape
    hidden, hidden2, out_dim = w1.shape[1], w2.shape[1], w3.shape[1]
    out_dtype = z.dtype if out_dtype is None else out_dtype

    # ---- lane-dense padding of weights / output only (zero pad => exact results) ----
    h1_p = _round_up(hidden, _LANE)
    h2_p = _round_up(hidden2, _LANE)
    od_p = _round_up(out_dim, _LANE)

    def pad2(a, rows, cols):
        pr, pc = rows - a.shape[0], cols - a.shape[1]
        return a if (pr == 0 and pc == 0) else jnp.pad(a, ((0, pr), (0, pc)))

    w1p, b1p = pad2(w1, noise_dim, h1_p), pad2(b1, 1, h1_p)   # z keeps native last dim
    w2p, b2p = pad2(w2, h1_p, h2_p), pad2(b2, 1, h2_p)
    w3p, b3p = pad2(w3, h2_p, od_p), pad2(b3, 1, od_p)

    # ---- batch tiling: large tiles, but keep >=2 grid steps when possible (v7x 2 TCs) ----
    half = -(-B // 2)
    tile = max(_SUBLANE, min(tile_b, _round_up(half, _SUBLANE)))
    Bp = _round_up(B, tile)
    zp = pad2(z, Bp, noise_dim)            # batch pad only; feature dim stays native
    grid = (Bp // tile,)

    def resident(shape):
        # Constant block index across the batch grid axis -> weights stay VMEM resident.
        if single_buffer_weights:
            try:
                return pl.BlockSpec(shape, lambda i: (0, 0),
                                    pipeline_mode=pl.Buffered(1))
            except TypeError:  # older BlockSpec without pipeline_mode kwarg
                pass
        return pl.BlockSpec(shape, lambda i: (0, 0))

    # ---- generation-aware VMEM budget (v5e/v6e: 128 MiB phys, v7x: 64 MiB) ----
    try:
        vmem_cap = int(pltpu.get_tpu_info().vmem_capacity_bytes)
    except Exception:
        vmem_cap = 64 * 2**20
    vmem_limit = max(32 * 2**20, vmem_cap - 16 * 2**20)

    out_padded = pl.pallas_call(
        _generator_kernel,
        out_shape=jax.ShapeDtypeStruct((Bp, od_p), out_dtype),
        grid_spec=pltpu.PrefetchScalarGridSpec(
            num_scalar_prefetch=0,
            grid=grid,
            in_specs=[
                pl.BlockSpec((tile, noise_dim), lambda i: (i, 0)),  # z tile, native width
                resident((noise_dim, h1_p)),                        # w1
                resident((1, h1_p)),                                # b1
                resident((h1_p, h2_p)),                             # w2
                resident((1, h2_p)),                                # b2
                resident((h2_p, od_p)),                             # w3
                resident((1, od_p)),                                # b3
            ],
            out_specs=pl.BlockSpec((tile, od_p), lambda i: (i, 0)),
        ),
        compiler_params=pltpu.CompilerParams(
            dimension_semantics=("parallel",),
            vmem_limit_bytes=vmem_limit,
        ),
    )(zp, w1p, b1p, w2p, b2p, w3p, b3p)

    if return_padded:
        return out_padded            # lane-dense (Bp, od_p) slab, no extra copy
    return out_padded[:B, :out_dim]


def init_generator_params(key, noise_dim, hidden_dim, output_dim, dtype=jnp.float32):
    """Matches PyTorch nn.Linear default init U(-1/sqrt(fan_in), 1/sqrt(fan_in)).
    Weights are stored transposed: (in_features, out_features)."""
    dims = [(noise_dim, hidden_dim),
            (hidden_dim, hidden_dim * 2),
            (hidden_dim * 2, output_dim)]
    params = {}
    keys = jax.random.split(key, 6)
    for idx, (fan_in, fan_out) in enumerate(dims):
        bound = 1.0 / jnp.sqrt(jnp.float32(fan_in))
        params[f"w{idx + 1}"] = jax.random.uniform(
            keys[2 * idx], (fan_in, fan_out), jnp.float32, -bound, bound).astype(dtype)
        params[f"b{idx + 1}"] = jax.random.uniform(
            keys[2 * idx + 1], (1, fan_out), jnp.float32, -bound, bound).astype(dtype)
    return params


def _reference_forward(z, params):
    f32 = lambda a: a.astype(jnp.float32)
    hi = jax.lax.Precision.HIGHEST
    h1 = jnp.maximum(jnp.dot(z, f32(params["w1"]), precision=hi) + f32(params["b1"]), 0.0)
    h2 = jnp.maximum(jnp.dot(h1, f32(params["w2"]), precision=hi) + f32(params["b2"]), 0.0)
    return jnp.tanh(jnp.dot(h2, f32(params["w3"]), precision=hi) + f32(params["b3"]))


if __name__ == "__main__":
    noise_dim, hidden_dim, output_dim = 16, 32, 24
    batch = 16

    key = jax.random.PRNGKey(0)
    k_z, k_p = jax.random.split(key)
    z = jax.random.normal(k_z, (batch, noise_dim), jnp.float32)
    params = init_generator_params(k_p, noise_dim, hidden_dim, output_dim)

    ref = _reference_forward(z, params)

    # f32 path: matches the PyTorch module's semantics.
    out = jax.block_until_ready(generator_forward(z, params))
    assert out.shape == (batch, output_dim)
    assert jnp.allclose(out, ref, atol=1e-4, rtol=1e-4), "f32 mismatch vs. reference"

    # bf16-weight fast path (v5e/v6e/v7x MXU peak); f32 accumulation, looser tolerance.
    out_bf16 = jax.block_until_ready(
        generator_forward(z, params, param_dtype=jnp.bfloat16))
    assert out_bf16.shape == (batch, output_dim)
    assert jnp.allclose(out_bf16, ref, atol=1e-1), "bf16 path diverged from reference"

    print("KERNEL_OK")
</pallas_src>

<mosaic_0001>
module attributes {stable_mosaic.version = 11 : i64} {
  func.func @_generator_kernel(%arg0: i32, %arg1: memref<8x16xf32, #tpu.memory_space<vmem>>, %arg2: memref<16x128xf32, #tpu.memory_space<vmem>>, %arg3: memref<1x128xf32, #tpu.memory_space<vmem>>, %arg4: memref<128x128xf32, #tpu.memory_space<vmem>>, %arg5: memref<1x128xf32, #tpu.memory_space<vmem>>, %arg6: memref<128x128xf32, #tpu.memory_space<vmem>>, %arg7: memref<1x128xf32, #tpu.memory_space<vmem>>, %arg8: memref<8x128xf32, #tpu.memory_space<vmem>>) attributes {dimension_semantics = [#tpu.dimension_semantics<parallel>], iteration_bounds = array<i64: 2>, scalar_prefetch = 0 : i64, scratch_operands = 0 : i64, tpu.core_type = #tpu.core_type<tc>, window_params = [{transform_indices = @transform_0, window_bounds = array<i64: 8, 16>}, {pipeline_mode = #tpu.pipeline_mode<synchronous>, transform_indices = @transform_1, window_bounds = array<i64: 16, 128>}, {pipeline_mode = #tpu.pipeline_mode<synchronous>, transform_indices = @transform_2, window_bounds = array<i64: 1, 128>}, {pipeline_mode = #tpu.pipeline_mode<synchronous>, transform_indices = @transform_3, window_bounds = array<i64: 128, 128>}, {pipeline_mode = #tpu.pipeline_mode<synchronous>, transform_indices = @transform_4, window_bounds = array<i64: 1, 128>}, {pipeline_mode = #tpu.pipeline_mode<synchronous>, transform_indices = @transform_5, window_bounds = array<i64: 128, 128>}, {pipeline_mode = #tpu.pipeline_mode<synchronous>, transform_indices = @transform_6, window_bounds = array<i64: 1, 128>}, {transform_indices = @transform_7, window_bounds = array<i64: 8, 128>}]} {
    %c0 = arith.constant 0 : index
    %c0_0 = arith.constant 0 : index
    %0 = vector.load %arg1[%c0, %c0_0] : memref<8x16xf32, #tpu.memory_space<vmem>>, vector<8x16xf32>
    %c0_1 = arith.constant 0 : index
    %c0_2 = arith.constant 0 : index
    %1 = vector.load %arg2[%c0_1, %c0_2] : memref<16x128xf32, #tpu.memory_space<vmem>>, vector<16x128xf32>
    %cst = arith.constant dense<0.000000e+00> : vector<8x128xf32>
    %2 = tpu.matmul %0, %1, %cst {dimension_numbers = #tpu.dot_dimension_numbers<[1], [0], [0], [1], [0, 0, 1, 1], [], []>} : vector<8x16xf32>, vector<16x128xf32>, vector<8x128xf32> -> vector<8x128xf32>
    %c0_3 = arith.constant 0 : index
    %c0_4 = arith.constant 0 : index
    %3 = vector.load %arg3[%c0_3, %c0_4] : memref<1x128xf32, #tpu.memory_space<vmem>>, vector<1x128xf32>
    %4 = vector.broadcast %3 : vector<1x128xf32> to vector<8x128xf32>
    %5 = arith.addf %2, %4 : vector<8x128xf32>
    %cst_5 = arith.constant 0.000000e+00 : f32
    %6 = vector.broadcast %cst_5 : f32 to vector<8x128xf32>
    %7 = arith.maximumf %5, %6 : vector<8x128xf32>
    %c0_6 = arith.constant 0 : index
    %c0_7 = arith.constant 0 : index
    %8 = vector.load %arg4[%c0_6, %c0_7] : memref<128x128xf32, #tpu.memory_space<vmem>>, vector<128x128xf32>
    %cst_8 = arith.constant dense<0.000000e+00> : vector<8x128xf32>
    %9 = tpu.matmul %7, %8, %cst_8 {dimension_numbers = #tpu.dot_dimension_numbers<[1], [0], [0], [1], [0, 0, 1, 1], [], []>} : vector<8x128xf32>, vector<128x128xf32>, vector<8x128xf32> -> vector<8x128xf32>
    %c0_9 = arith.constant 0 : index
    %c0_10 = arith.constant 0 : index
    %10 = vector.load %arg5[%c0_9, %c0_10] : memref<1x128xf32, #tpu.memory_space<vmem>>, vector<1x128xf32>
    %11 = vector.broadcast %10 : vector<1x128xf32> to vector<8x128xf32>
    %12 = arith.addf %9, %11 : vector<8x128xf32>
    %cst_11 = arith.constant 0.000000e+00 : f32
    %13 = vector.broadcast %cst_11 : f32 to vector<8x128xf32>
    %14 = arith.maximumf %12, %13 : vector<8x128xf32>
    %c0_12 = arith.constant 0 : index
    %c0_13 = arith.constant 0 : index
    %15 = vector.load %arg6[%c0_12, %c0_13] : memref<128x128xf32, #tpu.memory_space<vmem>>, vector<128x128xf32>
    %cst_14 = arith.constant dense<0.000000e+00> : vector<8x128xf32>
    %16 = tpu.matmul %14, %15, %cst_14 {dimension_numbers = #tpu.dot_dimension_numbers<[1], [0], [0], [1], [0, 0, 1, 1], [], []>} : vector<8x128xf32>, vector<128x128xf32>, vector<8x128xf32> -> vector<8x128xf32>
    %c0_15 = arith.constant 0 : index
    %c0_16 = arith.constant 0 : index
    %17 = vector.load %arg7[%c0_15, %c0_16] : memref<1x128xf32, #tpu.memory_space<vmem>>, vector<1x128xf32>
    %18 = vector.broadcast %17 : vector<1x128xf32> to vector<8x128xf32>
    %19 = arith.addf %16, %18 : vector<8x128xf32>
    %20 = math.tanh %19 : vector<8x128xf32>
    %c0_17 = arith.constant 0 : index
    %c0_18 = arith.constant 0 : index
    %21 = vector.load %arg8[%c0_17, %c0_18] : memref<8x128xf32, #tpu.memory_space<vmem>>, vector<8x128xf32>
    tpu.vector_store %arg8[%c0_17, %c0_18], %20 {strides = array<i32>} : memref<8x128xf32, #tpu.memory_space<vmem>>, vector<8x128xf32>,
    return
  }
  func.func @transform_0(%arg0: i32) -> (i32, i32) {
    %c0_i32 = arith.constant 0 : i32
    %c0_i32_0 = arith.constant 0 : i32
    return %arg0, %c0_i32 : i32, i32
  }
  func.func @transform_1(%arg0: i32) -> (i32, i32) {
    %c0_i32 = arith.constant 0 : i32
    %c0_i32_0 = arith.constant 0 : i32
    %c0_i32_1 = arith.constant 0 : i32
    return %c0_i32, %c0_i32_0 : i32, i32
  }
  func.func @transform_2(%arg0: i32) -> (i32, i32) {
    %c0_i32 = arith.constant 0 : i32
    %c0_i32_0 = arith.constant 0 : i32
    %c0_i32_1 = arith.constant 0 : i32
    return %c0_i32, %c0_i32_0 : i32, i32
  }
  func.func @transform_3(%arg0: i32) -> (i32, i32) {
    %c0_i32 = arith.constant 0 : i32
    %c0_i32_0 = arith.constant 0 : i32
    %c0_i32_1 = arith.constant 0 : i32
    return %c0_i32, %c0_i32_0 : i32, i32
  }
  func.func @transform_4(%arg0: i32) -> (i32, i32) {
    %c0_i32 = arith.constant 0 : i32
    %c0_i32_0 = arith.constant 0 : i32
    %c0_i32_1 = arith.constant 0 : i32
    return %c0_i32, %c0_i32_0 : i32, i32
  }
  func.func @transform_5(%arg0: i32) -> (i32, i32) {
    %c0_i32 = arith.constant 0 : i32
    %c0_i32_0 = arith.constant 0 : i32
    %c0_i32_1 = arith.constant 0 : i32
    return %c0_i32, %c0_i32_0 : i32, i32
  }
  func.func @transform_6(%arg0: i32) -> (i32, i32) {
    %c0_i32 = arith.constant 0 : i32
    %c0_i32_0 = arith.constant 0 : i32
    %c0_i32_1 = arith.constant 0 : i32
    return %c0_i32, %c0_i32_0 : i32, i32
  }
  func.func @transform_7(%arg0: i32) -> (i32, i32) {
    %c0_i32 = arith.constant 0 : i32
    %c0_i32_0 = arith.constant 0 : i32
    return %arg0, %c0_i32 : i32, i32
  }
}

</mosaic_0001>

<bundles_post_ra>
// kernel: tpu_custom_call.1
= control target key start
LH: loop header
LB: loop body
LE: loop exit
PB: predicated region body
PF: predicated region fallthrough
CT: control target
= control target key end

     0   :  { %12 = vsyncpa [#allocation3], 0  ;;  %s1532_s0 = inlined_call_operand.hbm [shape: f32[16,16], index: 0, kind: input, shape index: {}]   ;;  %s1533_s1 = inlined_call_operand.hbm [shape: f32[16,128], index: 1, kind: input, shape index: {}]   ;;  %s1534_s2 = inlined_call_operand.vmem [shape: f32[1,128], index: 2, kind: input, shape index: {}]   ;;  %s1535_s3 = inlined_call_operand.hbm [shape: f32[128,128], index: 3, kind: input, shape index: {}]   ;;  %s1536_s4 = inlined_call_operand.vmem [shape: f32[1,128], index: 4, kind: input, shape index: {}]   ;;  %s1537_s5 = inlined_call_operand.hbm [shape: f32[128,128], index: 5, kind: input, shape index: {}]   ;;  %s1538_s6 = inlined_call_operand.vmem [shape: f32[1,128], index: 6, kind: input, shape index: {}]   ;;  %s1539_s7 = inlined_call_operand.hbm [shape: f32[16,128], index: 7, kind: output, shape index: {}]  }
   0x1   :  { %14 = vsyncpa [#allocation3 + $0x1], 0 }
   0x2   :  { %15 = vsyncpa [#allocation6], 0 }
   0x3   :  { %16 = vsyncpa [#allocation9], 0 }
   0x4   :  { %17 = vsyncpa [#allocation4], 0 }
   0x5   :  { %19 = vsyncpa [#allocation4 + $0x1], 0  ;;  %s1236_s24 = smov 0   ;;  %s1238_s25 = smov 0  }
   0x6   :  { %s1240_s26 = smov 0   ;;  %s1242_s27 = smov 0  }
   0x7 LB: > { %s1257_s28 = sadd.s32 4294967295, %s1184_s27   ;;  %s725_s29 = sadd.s32 4294967294, %s1184_s27   ;;  %s1184_s27 = sphi %s1242_s27, %s1565_s27   ;;  %s1180_s26 = sphi %s1240_s26, %s1564_s26   ;;  %s1176_s25 = sphi %s1238_s25, %s1563_s25   ;;  %s1172_s24 = sphi %s1236_s24, %s1562_s24  }
   0x8   : > { %p45_p0 = scmp.ne.s32.totalorder %s1176_s25, %s1172_s24  ;;  %p1540_p1 = scmp.eq.s32.totalorder %s1257_s28, 0 }
   0x9   : > { %p201_p3 = scmp.eq.s32.totalorder %s725_s29, 1  ;;  %p726_p5 = scmp.ge.s32.totalorder %s1184_s27, 1 }
   0xa   : > { %p1266_p4 = por %p1540_p1, %p45_p0  ;;  %p208_p7 = scmp.lt.s32.totalorder %s1184_s27, 3 }
   0xb   : > { %p1271_p6 = por %p201_p3, %p45_p0  ;;  %s1186_s10 = smov [#allocation5]  }
   0xc   : > { %s1544_s30 = scalar_select %p1266_p4, 1, 0 }
   0xd   : > { %s1545_s8 = scalar_select %p1271_p6, 1, 0 }
   0xe   : > { %p1276_p8 = pnand %p726_p5, %p208_p7  ;;  %s220_s11 = sshll.u32 %s1186_s10, 4  ;;  %s1280_s11 = int_to_ptr.vmem [resolvable:$true] %s220_s11 }
   0xf   : > { %1546 = sst [smem:[#allocation15_spill]] %s1545_s8  ;;  %s1187_s13 = smov [#allocation7]  }
  0x10   : > { %s1547_s9 = scalar_select %p1276_p8, 1, 0 }
  0x11   : > { %p928_p9 = pneg %p1276_p8  ;;  %s236_s14 = sshll.u32 %s1187_s13, 4  ;;  %s1291_s14 = int_to_ptr.vmem [resolvable:$true] %s236_s14 }
  0x12   : > { %s1188_s15 = smov [#allocation8]   ;;  %s996_s19 = scalar_lea.hbm %s1533_s1, 256 }
  0x13   : > { %p1287_p11 = pnand %p928_p9, %p1540_p1  ;;  %s1293_s16 = sshll.u32 %s1188_s15, 4  ;;  %s253_s16 = int_to_ptr.vmem [resolvable:$true] %s1293_s16 }
  0x14   : > { %p997_p12 = scmp.ne.s32.totalorder %s1533_s1, %s996_s19  ;;  %p1003_p5 = scmp.lt.u32.totalorder %s996_s19, %s1533_s1 }
  0x15   : > { %p1303_p13 = pneg %p1287_p11 }
  0x17   : > { %p999_p0 = pnand %p1303_p13, %p997_p12 }
  0x19   : > { %p1000_p3 = pneg %p999_p0 }
  0x1b   : > { %p1005_p7 = pnand %p1003_p5, %p1000_p3 }
  0x1d   : > { %1008 = shalt.err (!%p1005_p7)
}
  0x1e   : > { %s1009_s10 = scalar_lea.vmem %s1280_s11, 256  ;;  %p1017_p2 = scmp.lt.s32.totalorder %s1280_s11, %s1280_s11 }
  0x1f   : > { %p1010_p9 = scmp.ne.s32.totalorder %s1280_s11, %s1009_s10  ;;  %p1018_p6 = scmp.lt.s32.totalorder %s1009_s10, %s1009_s10 }
  0x21   : > { %p1012_p10 = pnand %p1010_p9, %p1303_p13  ;;  %p1019_p12 = por %p1018_p6, %p1017_p2 }
  0x23   : > { %p1013_p1 = pneg %p1012_p10 }
  0x25   : > { %p1020_p0 = pnand %p1019_p12, %p1013_p1 }
  0x27   : > { %1023 = shalt.err (!%p1020_p0)
}
  0x28   : > { %s1189_s13 = smov 128   ;;  %s1190_s15 = smov 8  }
  0x29   : > { %931 = dma.hbm_to_vmem [thread:$0]  (!%p1287_p11), %s1533_s1, 256, %s1280_s11, [#allocation6], %s1189_s13, %s1189_s13, %s1190_s15  }
  0x2a   : > { %s1024_s21 = scalar_lea.hbm %s1535_s3, 2048 }
  0x2b   : > { %p1025_p1 = scmp.ne.s32.totalorder %s1535_s3, %s1024_s21  ;;  %p1031_p10 = scmp.lt.u32.totalorder %s1024_s21, %s1535_s3 }
  0x2d   : > { %p1027_p2 = pnand %p1025_p1, %p1303_p13 }
  0x2f   : > { %p1028_p6 = pneg %p1027_p2 }
  0x31   : > { %p1033_p3 = pnand %p1031_p10, %p1028_p6 }
  0x33   : > { %1036 = shalt.err (!%p1033_p3)
}
  0x34   : > { %s1037_s11 = scalar_lea.vmem %s1291_s14, 2048  ;;  %p1045_p12 = scmp.lt.s32.totalorder %s1291_s14, %s1291_s14 }
  0x35   : > { %p1038_p5 = scmp.ne.s32.totalorder %s1291_s14, %s1037_s11  ;;  %p1046_p0 = scmp.lt.s32.totalorder %s1037_s11, %s1037_s11 }
  0x37   : > { %p1040_p7 = pnand %p1038_p5, %p1303_p13  ;;  %p1047_p1 = por %p1046_p0, %p1045_p12 }
  0x39   : > { %p1041_p9 = pneg %p1040_p7 }
  0x3b   : > { %p1048_p2 = pnand %p1047_p1, %p1041_p9 }
  0x3d   : > { %1051 = shalt.err (!%p1048_p2)
}
  0x3e   : > { %934 = dma.hbm_to_vmem [thread:$0]  (!%p1287_p11), %s1535_s3, 2048, %s1291_s14, [#allocation6], %s1189_s13, %s1189_s13, %s1190_s15  }
  0x3f   : > { %s1052_s20 = scalar_lea.hbm %s1537_s5, 2048 }
  0x40   : > { %p1053_p6 = scmp.ne.s32.totalorder %s1537_s5, %s1052_s20  ;;  %p1059_p5 = scmp.lt.u32.totalorder %s1052_s20, %s1537_s5 }
  0x42   : > { %p1055_p10 = pnand %p1053_p6, %p1303_p13 }
  0x44   : > { %p1056_p3 = pneg %p1055_p10 }
  0x46   : > { %p1061_p7 = pnand %p1059_p5, %p1056_p3 }
  0x48   : > { %1064 = shalt.err (!%p1061_p7)
}
  0x49   : > { %s1065_s11 = scalar_lea.vmem %s253_s16, 2048  ;;  %p1073_p1 = scmp.lt.s32.totalorder %s253_s16, %s253_s16 }
  0x4a   : > { %p1066_p9 = scmp.ne.s32.totalorder %s253_s16, %s1065_s11  ;;  %p1074_p2 = scmp.lt.s32.totalorder %s1065_s11, %s1065_s11 }
  0x4c   : > { %p1068_p12 = pnand %p1066_p9, %p1303_p13  ;;  %p1075_p4 = por %p1074_p2, %p1073_p1 }
  0x4e   : > { %p1069_p0 = pneg %p1068_p12 }
  0x50   : > { %p1076_p8 = pnand %p1075_p4, %p1069_p0 }
  0x52   : > { %1079 = shalt.err (!%p1076_p8)
}
  0x53   : > { %937 = dma.hbm_to_vmem [thread:$0]  (!%p1287_p11), %s1537_s5, 2048, %s253_s16, [#allocation9], %s1189_s13, %s1189_s13, %s1190_s15  }
  0x54   : > { %s1376_s22 = sadd.s32 1, %s1184_s27   ;;  %s32_s17 = sadd.s32 1, %s1180_s26 }
  0x55   : > { %s29_s12 = ssub.s32 %s1184_s27, %s1376_s22  ;;  %p39_p8 = scmp.ne.s32.totalorder %s1180_s26, %s1176_s25 }
  0x56   : > { %p30_p4 = scmp.eq.s32.totalorder %s29_s12, 0  ;;  %p40_p13 = scmp.eq.s32.totalorder %s1184_s27, 0 }
  0x57   : > { %p949_p6 = scmp.lt.s32.totalorder %s1184_s27, 2  ;;  %p1550_p3 = scmp.eq.s32.totalorder %s1257_s28, 1 }
  0x58   : > { %s1386_s18 = scalar_select %p30_p4, %s1180_s26, %s32_s17  }
  0x59   : > { %p41_p10 = por %p40_p13, %p39_p8  ;;  %p1390_p5 = por %p1550_p3, %p39_p8 }
  0x5a   : > { %s269_s20 = sand.u32 1, %s1180_s26   ;;  %s732_s21 = sshll.u32 %s1184_s27, 7 }
  0x5b   : > { %s731_s16 = sshll.u32 %s269_s20, 3  ;;  %s1399_s23 = scalar_lea.hbm %s1532_s0, %s732_s21 }
  0x5c   : > { %s273_s29 = scalar_lea.vmem [#allocation2], %s731_s16  ;;  %p1401_p11 = pnand %p949_p6, %p41_p10 }
  0x5d   : > { %s280_s10 = sshll.u32 %s273_s29, 4  ;;  %s270_s14 = scalar_lea.sflag [#allocation3], %s269_s20  ;;  %s1405_s10 = int_to_ptr.vmem [resolvable:$true] %s280_s10 }
  0x5e   : > { %s1080_s8 = scalar_lea.hbm %s1399_s23, 128  ;;  %p1082_p9 = pneg %p1401_p11 }
  0x5f   : > { %p1081_p7 = scmp.ne.s32.totalorder %s1399_s23, %s1080_s8  ;;  %s1085_s21 = scalar_lea.hbm %s1532_s0, 256 }
  0x60   : > { %p1086_p1 = scmp.lt.u32.totalorder %s1399_s23, %s1532_s0  ;;  %p1087_p2 = scmp.lt.u32.totalorder %s1085_s21, %s1080_s8 }
  0x61   : > { %p1083_p12 = pnand %p1082_p9, %p1081_p7  ;;  %p1089_p8 = scmp.lt.u32.totalorder %s1080_s8, %s1399_s23 }
  0x62   : > { %p1088_p4 = por %p1087_p2, %p1086_p1 }
  0x63   : > { %p1084_p0 = pneg %p1083_p12 }
  0x64   : > { %p1090_p13 = por %p1089_p8, %p1088_p4 }
  0x66   : > { %p1091_p6 = pnand %p1090_p13, %p1084_p0 }
  0x68   : > { %1094 = shalt.err (!%p1091_p6)
}
  0x69   : > { %s1095_s20 = scalar_lea.vmem %s1405_s10, 128  ;;  %s1191_s15 = smov [#allocation2]  }
  0x6a   : > { %p1096_p10 = scmp.ne.s32.totalorder %s1405_s10, %s1095_s20  ;;  %s1100_s29 = sshll.u32 %s1191_s15, 4  ;;  %s1101_s29 = int_to_ptr.vmem [resolvable:$false] %s1100_s29 }
  0x6b   : > { %s1102_s12 = scalar_lea.vmem %s1101_s29, 256  ;;  %p1103_p12 = scmp.lt.s32.totalorder %s1405_s10, %s1101_s29 }
  0x6c   : > { %p1098_p3 = pnand %p1096_p10, %p1082_p9  ;;  %p1104_p1 = scmp.lt.s32.totalorder %s1102_s12, %s1095_s20 }
  0x6e   : > { %p1099_p7 = pneg %p1098_p3  ;;  %p1105_p2 = por %p1104_p1, %p1103_p12 }
  0x70   : > { %p1106_p4 = pnand %p1105_p2, %p1099_p7 }
  0x72   : > { %1109 = shalt.err (!%p1106_p4)
}
  0x73   : > { %941 = dma.hbm_to_vmem [thread:$0]  (!%p1401_p11), %s1399_s23, 128, %s1405_s10, %s270_s14  }
  0x74   : > { %p1553_p0 = scmp.ne.s32.totalorder %s1547_s9, 0 }
  0x75   : > { %s1435_s8 = sand.u32 (!%p1553_p0), 1, %s1176_s25   ;;  %p1554_p9 = scmp.ne.s32.totalorder (!%p1553_p0), %s1544_s30, 0 }
  0x76   : > { %289 = sbr.rel (%p1553_p0) target bundleno = 811 (0x32b), region = 48  ;;  %s734_s17 = sshll.u32 (!%p1553_p0), %s1435_s8, 3 }
  0x77   : > { %s292_s21 = scalar_lea.sflag (!%p1553_p0), [#allocation3], %s1435_s8  ;;  %s295_s16 = scalar_lea.vmem (!%p1553_p0), [#allocation2], %s734_s17 }
  0x7d   : > { %1155 = dma.done.wait (%p1554_p9), %s292_s21, 128  }
  0x7e   : > { %1157 = vsyncadd (%p1554_p9), %s292_s21, 4294967168  ;;  %p1555_p11 = scmp.eq.s32.totalorder %s1257_s28, 0 }
  0x80   : > { %1159 = dma.done.wait (%p1555_p11), [#allocation6], 2304   ;;  %p1556_p8 = pmov %p1555_p11 }
  0x82   : > { %1161 = vsyncadd (%p1556_p8), [#allocation6], 4294964992  ;;  %p1557_p13 = pmov %p1556_p8 }
  0x83   : > { %p1558_p6 = pmov %p1556_p8 }
  0x84   : > { %1163 = dma.done.wait (%p1557_p13), [#allocation9], 2048  }
  0x85   : > { %1165 = vsyncadd (%p1558_p6), [#allocation9], 4294965248  ;;  %v1192_v0 = vmov 0.0|0.0   ;;  %vm1193_vm0 = vmmov 0   ;;  %v1194_v1 = vmov 0.0   ;;  %v339_v2 = vld [vmem:[#allocation5] sm:$0xff] }
  0x86   : > { %861 = vmatprep.subr.bf16.mxu0 %v1192_v0  ;;  %788 = vmatprep.mubr.msk.f32.mxu0 %vm1193_vm0, %v1194_v1  ;;  %v340_v3 = vld [vmem:[#allocation5 + $0x8] sm:$0xff]  ;;  %v423_v5 = vld [vmem:[#allocation7] sm:$0xff]  ;;  %v424_v6 = vld [vmem:[#allocation7 + $0x8] sm:$0xff]  ;;  %vm348_vm1 = vcmask 130048   ;;  %s744_s13 = sshll.u32 %s1257_s28, 7  ;;  %s337_s20 = scalar_lea.vmem [#allocation10], %s734_s17 }
  0x87   : > { %864 = vmatprep.subr.bf16.mxu1 %v1192_v0  ;;  %823 = vmatprep.mubr.msk.f32.mxu1 %vm1193_vm0, %v1194_v1  ;;  %v862_v4 = vpack.c.bf16 %v340_v3, %v339_v2  ;;  %v425_v7 = vld [vmem:[#allocation7 + $0x10] sm:$0xff]  ;;  %v865_v8 = vpack.c.bf16 %v424_v6, %v423_v5  ;;  %v426_v9 = vld [vmem:[#allocation7 + $0x18] sm:$0xff]  ;;  %v338_v10 = vld [vmem:[%s295_s16] sm:$0xff]  ;;  %s626_s15 = sshll.u32 %s337_s20, 4  ;;  %s1488_s21 = scalar_lea.hbm %s1539_s7, %s744_s13  ;;  %s1490_s15 = int_to_ptr.vmem [resolvable:$true] %s626_s15 }
  0x88   : > { %v868_v11 = vpack.c.bf16 %v426_v9, %v425_v7  ;;  %v427_v12 = vld [vmem:[#allocation7 + $0x20] sm:$0xff]  ;;  %v428_v13 = vld [vmem:[#allocation7 + $0x28] sm:$0xff]  ;;  %v429_v15 = vld [vmem:[#allocation7 + $0x30] sm:$0xff]  ;;  %s613_s16 = scalar_lea.sflag [#allocation4], %s1435_s8  ;;  %s1110_s30 = scalar_lea.vmem %s1490_s15, 128 }
  0x89   : > { %863 = vmatpush3.bf16.msra.mxu0 %v862_v4  ;;  %866 = vmatpush3.bf16.msra.mxu1 %v865_v8  ;;  %v871_v14 = vpack.c.bf16 %v428_v13, %v427_v12  ;;  %v430_v16 = vld [vmem:[#allocation7 + $0x38] sm:$0xff]  ;;  %v431_v18 = vld [vmem:[#allocation7 + $0x40] sm:$0xff]  ;;  %v432_v19 = vld [vmem:[#allocation7 + $0x48] sm:$0xff]  ;;  %p1111_p10 = scmp.ne.s32.totalorder %s1490_s15, %s1110_s30  ;;  %s1195_s28 = smov [#allocation10]  }
  0x8a   : > { %888 = vmatprep.subr.bf16.mxu0 %v1192_v0  ;;  %867 = vmatprep.subr.bf16.mxu1 %v1192_v0  ;;  %v874_v17 = vpack.c.bf16 %v430_v16, %v429_v15  ;;  %v877_v20 = vpack.c.bf16 %v432_v19, %v431_v18  ;;  %v433_v21 = vld [vmem:[#allocation7 + $0x50] sm:$0xff]  ;;  %v434_v22 = vld [vmem:[#allocation7 + $0x58] sm:$0xff]  ;;  %v435_v24 = vld [vmem:[#allocation7 + $0x60] sm:$0xff]  ;;  %s1114_s17 = sshll.u32 %s1195_s28, 4  ;;  %s1115_s17 = int_to_ptr.vmem [resolvable:$false] %s1114_s17 }
  0x8b   : > { %v880_v23 = vpack.c.bf16 %v434_v22, %v433_v21  ;;  %v436_v25 = vld [vmem:[#allocation7 + $0x68] sm:$0xff]  ;;  %v437_v27 = vld [vmem:[#allocation7 + $0x70] sm:$0xff]  ;;  %v438_v28 = vld [vmem:[#allocation7 + $0x78] sm:$0xff]  ;;  %p1112_p3 = pnand %p1111_p10, %p1390_p5  ;;  %s1116_s9 = scalar_lea.vmem %s1115_s17, 256 }
  0x8c   : > { %789 = vmatmul.mubr.msk.f32.vlgmr.msra.gmra.mrb[0].mxu0 %vm348_vm1, %v338_v10  ;;  %v883_v26 = vpack.c.bf16 %v436_v25, %v435_v24  ;;  %v886_v29 = vpack.c.bf16 %v438_v28, %v437_v27  ;;  %v517_v30 = vld [vmem:[#allocation8] sm:$0xff]  ;;  %v518_v31 = vld [vmem:[#allocation8 + $0x8] sm:$0xff]  ;;  %v519_v32 = vld [vmem:[#allocation8 + $0x10] sm:$0xff]  ;;  %p1117_p12 = scmp.lt.s32.totalorder %s1490_s15, %s1115_s17  ;;  %p1118_p1 = scmp.lt.s32.totalorder %s1116_s9, %s1110_s30 }
  0x8d   : > { %858 = vmatprep.mubr.msk.f32.mxu0 %vm1193_vm0, %v1194_v1  ;;  %869 = vmatpush3.bf16.msra.mxu1 %v868_v11  ;;  %v889_v33 = vpack.c.bf16 %v518_v31, %v517_v30  ;;  %v520_v34 = vld [vmem:[#allocation8 + $0x18] sm:$0xff]  ;;  %v521_v36 = vld [vmem:[#allocation8 + $0x20] sm:$0xff]  ;;  %v522_v37 = vld [vmem:[#allocation8 + $0x28] sm:$0xff]  ;;  %p1113_p7 = pneg %p1112_p3 }
  0x8e   : > { %870 = vmatprep.subr.bf16.mxu1 %v1192_v0  ;;  %v892_v35 = vpack.c.bf16 %v520_v34, %v519_v32  ;;  %v895_v38 = vpack.c.bf16 %v522_v37, %v521_v36  ;;  %v523_v39 = vld [vmem:[#allocation8 + $0x30] sm:$0xff]  ;;  %v524_v40 = vld [vmem:[#allocation8 + $0x38] sm:$0xff]  ;;  %v525_v42 = vld [vmem:[#allocation8 + $0x40] sm:$0xff]  ;;  %p1119_p2 = por %p1118_p1, %p1117_p12 }
  0x8f   : > { %890 = vmatpush3.bf16.msra.mxu0 %v889_v33  ;;  %v898_v41 = vpack.c.bf16 %v524_v40, %v523_v39  ;;  %v526_v43 = vld [vmem:[#allocation8 + $0x48] sm:$0xff]  ;;  %v527_v45 = vld [vmem:[#allocation8 + $0x50] sm:$0xff]  ;;  %v528_v46 = vld [vmem:[#allocation8 + $0x58] sm:$0xff] }
  0x90   : > { %891 = vmatprep.subr.bf16.mxu0 %v1192_v0  ;;  %v901_v44 = vpack.c.bf16 %v526_v43, %v525_v42  ;;  %v904_v47 = vpack.c.bf16 %v528_v46, %v527_v45  ;;  %v529_v48 = vld [vmem:[#allocation8 + $0x60] sm:$0xff]  ;;  %v530_v49 = vld [vmem:[#allocation8 + $0x68] sm:$0xff]  ;;  %v531_v56 = vld [vmem:[#allocation8 + $0x70] sm:$0xff]  ;;  %p1120_p4 = pnand %p1119_p2, %p1113_p7 }
  0x91   : > { %872 = vmatpush3.bf16.msra.mxu1 %v871_v14  ;;  %v907_v50 = vpack.c.bf16 %v530_v49, %v529_v48  ;;  %v739_v51 = vld [vmem:[%s1534_s2] ss:$0 sm:$0xff]  ;;  %v532_v57 = vld [vmem:[#allocation8 + $0x78] sm:$0xff] }
  0x92   : > { %873 = vmatprep.subr.bf16.mxu1 %v1192_v0  ;;  %v910_v58 = vpack.c.bf16 %v532_v57, %v531_v56  ;;  %v741_v59 = vld [vmem:[%s1536_s4] ss:$0 sm:$0xff] }
  0x93   : > { %893 = vmatpush3.bf16.msra.mxu0 %v892_v35 }
  0x94   : > { %894 = vmatprep.subr.bf16.mxu0 %v1192_v0 }
  0x95   : > { %875 = vmatpush3.bf16.msra.mxu1 %v874_v17 }
  0x96   : > { %876 = vmatprep.subr.bf16.mxu1 %v1192_v0 }
  0x97   : > { %896 = vmatpush3.bf16.msra.mxu0 %v895_v38 }
  0x98   : > { %897 = vmatprep.subr.bf16.mxu0 %v1192_v0 }
  0x99   : > { %878 = vmatpush3.bf16.msra.mxu1 %v877_v20 }
  0x9a   : > { %879 = vmatprep.subr.bf16.mxu1 %v1192_v0 }
  0x9b   : > { %899 = vmatpush3.bf16.msra.mxu0 %v898_v41 }
  0x9c   : > { %900 = vmatprep.subr.bf16.mxu0 %v1192_v0 }
  0x9d   : > { %881 = vmatpush3.bf16.msra.mxu1 %v880_v23 }
  0x9e   : > { %882 = vmatprep.subr.bf16.mxu1 %v1192_v0 }
  0x9f   : > { %902 = vmatpush3.bf16.msra.mxu0 %v901_v44 }
  0xa0   : > { %903 = vmatprep.subr.bf16.mxu0 %v1192_v0 }
  0xa1   : > { %884 = vmatpush3.bf16.msra.mxu1 %v883_v26 }
  0xa2   : > { %885 = vmatprep.subr.bf16.mxu1 %v1192_v0 }
  0xa3   : > { %905 = vmatpush3.bf16.msra.mxu0 %v904_v47 }
  0xa4   : > { %906 = vmatprep.subr.bf16.mxu0 %v1192_v0 }
  0xa5   : > { %887 = vmatpush3.bf16.msra.mxu1 %v886_v29 }
  0xa7   : > { %908 = vmatpush3.bf16.msra.mxu0 %v907_v50 }
  0xa8   : > { %909 = vmatprep.subr.bf16.mxu0 %v1192_v0  ;;  %v742_v0 = vld [vmem:[%s1538_s6] ss:$0 sm:$0xff] }
  0xab   : > { %911 = vmatpush3.bf16.msra.mxu0 %v910_v58 }
 0x15f   : > { %v418_v52 = vpop.f32.mrb[0].mxu0 }
 0x160   : > { %v419_v53 = vadd.f32 %v739_v51, %v418_v52  ;;  %v790_v54 = vpop.f32.mrb[1].mxu0 }
 0x162   : > { %v422_v55 = vmax.f32 %v419_v53, 0.0 }
 0x164   : > { %824 = vmatmul.mubr.f32.vlgmr.msra.gmra.mrb[0].mxu1 %v422_v55 }
 0x237   : > { %v512_v60 = vpop.f32.mrb[0].mxu1 }
 0x238   : > { %v513_v61 = vadd.f32 %v741_v59, %v512_v60  ;;  %v825_v62 = vpop.f32.mrb[1].mxu1 }
 0x23a   : > { %v516_v63 = vmax.f32 %v513_v61, 0.0 }
 0x23c   : > { %859 = vmatmul.mubr.f32.vlgmr.msra.gmra.mrb[2].mxu0 %v516_v63 }
 0x30f   : > { %v606_v1 = vpop.f32.mrb[2].mxu0 }
 0x310   : > { %v607_v2 = vadd.f32 %v742_v0, %v606_v1  ;;  %v860_v3 = vpop.f32.mrb[3].mxu0 }
 0x312   : > { %994 = vtanh.f32 %v607_v2 }
 0x31c   : > { %v995_v4 = vpop.eup %994 }
 0x31d   : > { %611 = vst [vmem:[%s337_s20] sm:$0xff] %v995_v4 }
 0x31e   : > { %1123 = shalt.err (!%p1120_p4)
}
 0x31f   : > { %s1124_s8 = scalar_lea.hbm %s1488_s21, 128  ;;  %s1128_s11 = scalar_lea.hbm %s1539_s7, 256 }
 0x320   : > { %p1125_p0 = scmp.ne.s32.totalorder %s1488_s21, %s1124_s8  ;;  %p1129_p8 = scmp.lt.u32.totalorder %s1488_s21, %s1539_s7 }
 0x321   : > { %p1130_p13 = scmp.lt.u32.totalorder %s1128_s11, %s1124_s8  ;;  %p1132_p10 = scmp.lt.u32.totalorder %s1124_s8, %s1488_s21 }
 0x322   : > { %p1126_p9 = pnand %p1125_p0, %p1390_p5 }
 0x323   : > { %p1131_p6 = por %p1130_p13, %p1129_p8 }
 0x324   : > { %p1127_p11 = pneg %p1126_p9 }
 0x325   : > { %p1133_p3 = por %p1132_p10, %p1131_p6 }
 0x327   : > { %p1134_p7 = pnand %p1133_p3, %p1127_p11 }
 0x329   : > { %1137 = shalt.err (!%p1134_p7)
}
 0x32a   : > { %926 = dma.vmem_to_hbm [thread:$0]  (%p1390_p5), %s1490_s15, 128, %s1488_s21, %s613_s16  }
 0x32b PF: > { %s1559_s20 = sld [smem:[#allocation15_spill]]  ;;  %s638_s29 = sand.u32 1, %s1172_s24  }
 0x32c   : > { %p1561_p1 = scmp.ge.s32.totalorder %s1184_s27, 2  ;;  %s639_s12 = scalar_lea.sflag [#allocation4], %s638_s29 }
 0x331   : > { %p1560_p12 = scmp.ne.s32.totalorder %s1559_s20, 0 }
 0x333   : > { %p943_p2 = pnand %p1561_p1, %p1560_p12 }
 0x335   : > { %1167 = dma.done.wait (!%p943_p2), %s639_s12, 128  }
 0x336   : > { %1169 = vsyncadd (!%p943_p2), %s639_s12, 4294967168  ;;  %p22_p4 = scmp.ge.s32.totalorder %s1376_s22, 4   ;;  %s1562_s24 = smov %s1176_s25 }
 0x337   : > { %s1563_s25 = smov %s1180_s26  ;;  %s1564_s26 = smov %s1386_s18 }
 0x338   : > { %s1565_s27 = smov %s1376_s22  ;;  %24 = sbr.rel (!%p22_p4) target bundleno = 7 (0x7), region = 105 }
 0x33f   :  { %644 = vsyncpa [#allocation3], 1 }
 0x340   :  { %646 = vsyncpa [#allocation3 + $0x1], 1 }
 0x341   :  { %647 = vsyncpa [#allocation6], 1 }
 0x342   :  { %648 = vsyncpa [#allocation9], 1 }
 0x343   :  { %649 = vsyncpa [#allocation4], 1 }
 0x344   :  { %651 = vsyncpa [#allocation4 + $0x1], 1 }

</bundles_post_ra>
